<compile_context>
chip_gen: v7x
topology: tpu7x:2x2x1
jax: 0.10.0
libtpu: 0.0.40
codegen_flags: <defaults>
</compile_context>

<pallas_src>
import jax
import jax.numpy as jnp
from jax.experimental import pallas as pl
from jax.experimental.pallas import tpu as pltpu


def _cfm_flow_kernel(n_steps: int):
    """Build the per-(batch, T-tile) kernel. Only `n_steps` is baked in."""
    dt = 1.0 / float(n_steps)

    def kernel(mu_ref, z_ref, mask_ref, cond_ref,
               w1x_ref, w1m_ref, w_t_ref, w2dt_ref, b2dt_ref,
               out_ref):
        # HBM I/O is bf16 (bandwidth); all in-kernel math is f32.
        mu   = mu_ref[0].astype(jnp.float32)     # (C, Tt)
        x    = z_ref[0].astype(jnp.float32)      # (C, Tt)  temperature pre-applied on host
        mask = mask_ref[0].astype(jnp.float32)   # (1, Tt)
        cond = cond_ref[0]                       # (H, 1)   = W_spk @ spk + b1 (host precomputed)

        w1x  = w1x_ref[...]                      # (H, C)
        w1m  = w1m_ref[...]                      # (H, C)
        w_t  = w_t_ref[...]                      # (H, 1)
        w2dt = w2dt_ref[...]                     # (C, H)   = dt * W2 (host pre-scaled)
        b2dt = b2dt_ref[...]                     # (C, 1)   = dt * b2 (host pre-scaled)

        # Loop-invariant precompute (hoisted out of the Euler loop).
        base = jnp.dot(w1m, mu, preferred_element_type=jnp.float32) + cond   # (H, Tt)
        b2m  = b2dt * mask                                                   # (C, Tt)

        # Fully-unrolled Euler ODE: n_steps is a small static int, so the
        # scheduler sees the whole loop and t_k constant-folds.
        for k in range(n_steps):
            tb = base if k == 0 else base + w_t * (k * dt)                   # (H, Tt)
            h = jnp.dot(w1x, x, preferred_element_type=jnp.float32) + tb     # (H, Tt)
            h = h * jax.nn.sigmoid(h)                                        # SiLU (EUP)
            # x += dt * (W2 @ h + b2) * mask   (dt folded into w2dt / b2m)
            x = x + jnp.dot(w2dt, h, preferred_element_type=jnp.float32) * mask + b2m

        out_ref[0] = x.astype(out_ref.dtype)

    return kernel


class CFMFlowPallas:
    """Pallas TPU implementation of CFMFlow (fixed-step Euler ODE sampler)."""

    def __init__(self, n_channels=8, spk_dim=16, hidden=32, seed=42):
        self.C, self.D, self.H = n_channels, spk_dim, hidden
        k1, k2, k3, k4, k5 = jax.random.split(jax.random.PRNGKey(seed), 5)
        s = 0.1
        self.w1x = jax.random.normal(k1, (hidden, n_channels), jnp.float32) * s
        self.w1m = jax.random.normal(k2, (hidden, n_channels), jnp.float32) * s
        self.b1 = jnp.zeros((hidden, 1), jnp.float32)
        self.w_spk = jax.random.normal(k3, (hidden, spk_dim), jnp.float32) * s
        self.w_t = jax.random.normal(k4, (hidden, 1), jnp.float32) * s
        self.w2 = jax.random.normal(k5, (n_channels, hidden), jnp.float32) * s
        self.b2 = jnp.zeros((n_channels, 1), jnp.float32)

    @staticmethod
    def _t_tiling(T):
        """Pad T to a lane-dense tile; tile capped at 512 lanes."""
        lane = 128
        t_pad = -(-T // lane) * lane
        if t_pad <= 512:
            return t_pad, t_pad            # single lane-dense tile
        t_tile = 512
        t_pad = -(-T // t_tile) * t_tile
        return t_pad, t_tile

    def __call__(self, mu, speaker_embedding, n_timesteps=5, mask=None,
                 temperature=1.0, noise_key=None):
        B, C, T = mu.shape
        assert C == self.C
        H = self.H
        n_steps = int(n_timesteps)
        dt = 1.0 / n_steps

        if mask is None:
            mask = jnp.ones((B, 1, T), jnp.float32)
        if noise_key is None:
            noise_key = jax.random.PRNGKey(0)

        # z ~ N(0, I) * temperature (host-side so temperature never triggers a
        # kernel recompile).
        z = jax.random.normal(noise_key, (B, C, T), jnp.float32) * float(temperature)

        # ---- T tiling: pad T so every output block is lane-dense. ----------
        T_pad, T_tile = self._t_tiling(T)
        pad = T_pad - T
        mu_p, mask_p = mu.astype(jnp.float32), mask.astype(jnp.float32)
        if pad:
            mu_p   = jnp.pad(mu_p,   ((0, 0), (0, 0), (0, pad)))
            z      = jnp.pad(z,      ((0, 0), (0, 0), (0, pad)))
            mask_p = jnp.pad(mask_p, ((0, 0), (0, 0), (0, pad)))  # padding masked out

        # ---- host-side conditioning / constant folding ----------------------
        # Speaker projection + b1 (tiny einsum; removes in-kernel XLU reduce
        # and two per-step adds).
        cond = jnp.einsum('hd,bd->bh', self.w_spk,
                          speaker_embedding.astype(jnp.float32))[:, :, None] + self.b1[None]
        w2dt = self.w2 * dt
        b2dt = self.b2 * dt

        # bf16 at the HBM boundary (kernel is bandwidth-bound at small n_steps);
        # all in-kernel compute stays f32.
        mu_b = mu_p.astype(jnp.bfloat16)
        z_b = z.astype(jnp.bfloat16)
        mask_b = mask_p.astype(jnp.bfloat16)   # exact for 0/1 masks

        kernel = _cfm_flow_kernel(n_steps)

        tiled3 = lambda c: pl.BlockSpec((1, c, T_tile), lambda b, j: (b, 0, j))
        const2 = lambda s: pl.BlockSpec(s, lambda b, j: (0, 0))

        out = pl.pallas_call(
            kernel,
            out_shape=jax.ShapeDtypeStruct((B, C, T_pad), jnp.float32),
            grid_spec=pltpu.PrefetchScalarGridSpec(
                num_scalar_prefetch=0,
                grid=(B, T_pad // T_tile),
                in_specs=[
                    tiled3(C),                                        # mu   (bf16)
                    tiled3(C),                                        # z    (bf16)
                    tiled3(1),                                        # mask (bf16)
                    pl.BlockSpec((1, H, 1), lambda b, j: (b, 0, 0)),  # cond = spk_h + b1
                    const2((H, C)),                                   # w1x
                    const2((H, C)),                                   # w1m
                    const2((H, 1)),                                   # w_t
                    const2((C, H)),                                   # w2 * dt
                    const2((C, 1)),                                   # b2 * dt
                ],
                out_specs=tiled3(C),
            ),
            compiler_params=pltpu.CompilerParams(
                dimension_semantics=("parallel", "parallel")),
        )(mu_b, z_b, mask_b, cond,
          self.w1x, self.w1m, self.w_t, w2dt, b2dt)

        return out[:, :, :T]

    # Pure-JAX reference for validation (original math / association order).
    # The kernel streams mu/z/mask through HBM as bf16, so the same input
    # rounding is applied here; all arithmetic is f32.
    def reference(self, mu, speaker_embedding, n_timesteps=5, mask=None,
                  temperature=1.0, noise_key=None):
        B, C, T = mu.shape
        if mask is None:
            mask = jnp.ones((B, 1, T), jnp.float32)
        if noise_key is None:
            noise_key = jax.random.PRNGKey(0)
        z = jax.random.normal(noise_key, (B, C, T), jnp.float32) * float(temperature)

        mu = mu.astype(jnp.bfloat16).astype(jnp.float32)
        z = z.astype(jnp.bfloat16).astype(jnp.float32)
        mask = mask.astype(jnp.bfloat16).astype(jnp.float32)

        x = z
        dt = 1.0 / n_timesteps
        spk_h = jnp.einsum('hd,bd->bh', self.w_spk, speaker_embedding)[:, :, None]
        mu_h = jnp.einsum('hc,bct->bht', self.w1m, mu)
        for k in range(n_timesteps):
            t = k * dt
            h = jnp.einsum('hc,bct->bht', self.w1x, x)
            h = h + mu_h + spk_h + self.w_t[None] * t + self.b1[None]
            h = h * jax.nn.sigmoid(h)
            v = (jnp.einsum('ch,bht->bct', self.w2, h) + self.b2[None]) * mask
            x = x + dt * v
        return x


if __name__ == "__main__":
    B, C, T, D, H = 2, 8, 16, 16, 32
    key = jax.random.PRNGKey(0)
    k_mu, k_spk, k_noise = jax.random.split(key, 3)
    mu = jax.random.normal(k_mu, (B, C, T), jnp.float32)
    spk = jax.random.normal(k_spk, (B, D), jnp.float32)

    flow = CFMFlowPallas(n_channels=C, spk_dim=D, hidden=H)

    out = flow(mu, spk, n_timesteps=5, temperature=1.0, noise_key=k_noise)
    out = jax.block_until_ready(out)
    assert out.shape == (B, C, T)

    ref = flow.reference(mu, spk, n_timesteps=5, temperature=1.0,
                         noise_key=k_noise)
    assert jnp.allclose(out, ref, atol=1e-3, rtol=1e-3), "mismatch vs reference"
    print("KERNEL_OK")
</pallas_src>

<mosaic_0001>
module attributes {stable_mosaic.version = 11 : i64} {
  func.func @kernel(%arg0: i32, %arg1: i32, %arg2: memref<1x8x128xbf16, #tpu.memory_space<vmem>>, %arg3: memref<1x8x128xbf16, #tpu.memory_space<vmem>>, %arg4: memref<1x1x128xbf16, #tpu.memory_space<vmem>>, %arg5: memref<1x32x1xf32, #tpu.memory_space<vmem>>, %arg6: memref<32x8xf32, #tpu.memory_space<vmem>>, %arg7: memref<32x8xf32, #tpu.memory_space<vmem>>, %arg8: memref<32x1xf32, #tpu.memory_space<vmem>>, %arg9: memref<8x32xf32, #tpu.memory_space<vmem>>, %arg10: memref<8x1xf32, #tpu.memory_space<vmem>>, %arg11: memref<1x8x128xf32, #tpu.memory_space<vmem>>) attributes {dimension_semantics = [#tpu.dimension_semantics<parallel>, #tpu.dimension_semantics<parallel>], iteration_bounds = array<i64: 2, 1>, scalar_prefetch = 0 : i64, scratch_operands = 0 : i64, tpu.core_type = #tpu.core_type<tc>, window_params = [{transform_indices = @transform_0, window_bounds = array<i64: 1, 8, 128>}, {transform_indices = @transform_1, window_bounds = array<i64: 1, 8, 128>}, {transform_indices = @transform_2, window_bounds = array<i64: 1, 1, 128>}, {transform_indices = @transform_3, window_bounds = array<i64: 1, 32, 1>}, {pipeline_mode = #tpu.pipeline_mode<synchronous>, transform_indices = @transform_4, window_bounds = array<i64: 32, 8>}, {pipeline_mode = #tpu.pipeline_mode<synchronous>, transform_indices = @transform_5, window_bounds = array<i64: 32, 8>}, {pipeline_mode = #tpu.pipeline_mode<synchronous>, transform_indices = @transform_6, window_bounds = array<i64: 32, 1>}, {pipeline_mode = #tpu.pipeline_mode<synchronous>, transform_indices = @transform_7, window_bounds = array<i64: 8, 32>}, {pipeline_mode = #tpu.pipeline_mode<synchronous>, transform_indices = @transform_8, window_bounds = array<i64: 8, 1>}, {transform_indices = @transform_9, window_bounds = array<i64: 1, 8, 128>}]} {
    %c0 = arith.constant 0 : index
    %c0_0 = arith.constant 0 : index
    %c0_1 = arith.constant 0 : index
    %0 = vector.load %arg2[%c0, %c0_0, %c0_1] : memref<1x8x128xbf16, #tpu.memory_space<vmem>>, vector<1x8x128xbf16>
    %1 = vector.shape_cast %0 : vector<1x8x128xbf16> to vector<8x128xbf16>
    %2 = arith.extf %1 : vector<8x128xbf16> to vector<8x128xf32>
    %c0_2 = arith.constant 0 : index
    %c0_3 = arith.constant 0 : index
    %c0_4 = arith.constant 0 : index
    %3 = vector.load %arg3[%c0_2, %c0_3, %c0_4] : memref<1x8x128xbf16, #tpu.memory_space<vmem>>, vector<1x8x128xbf16>
    %4 = vector.shape_cast %3 : vector<1x8x128xbf16> to vector<8x128xbf16>
    %5 = arith.extf %4 : vector<8x128xbf16> to vector<8x128xf32>
    %c0_5 = arith.constant 0 : index
    %c0_6 = arith.constant 0 : index
    %c0_7 = arith.constant 0 : index
    %6 = vector.load %arg4[%c0_5, %c0_6, %c0_7] : memref<1x1x128xbf16, #tpu.memory_space<vmem>>, vector<1x1x128xbf16>
    %7 = vector.shape_cast %6 : vector<1x1x128xbf16> to vector<1x128xbf16>
    %8 = arith.extf %7 : vector<1x128xbf16> to vector<1x128xf32>
    %c0_8 = arith.constant 0 : index
    %c0_9 = arith.constant 0 : index
    %c0_10 = arith.constant 0 : index
    %9 = vector.load %arg5[%c0_8, %c0_9, %c0_10] : memref<1x32x1xf32, #tpu.memory_space<vmem>>, vector<1x32x1xf32>
    %10 = vector.shape_cast %9 : vector<1x32x1xf32> to vector<32x1xf32>
    %c0_11 = arith.constant 0 : index
    %c0_12 = arith.constant 0 : index
    %11 = vector.load %arg6[%c0_11, %c0_12] : memref<32x8xf32, #tpu.memory_space<vmem>>, vector<32x8xf32>
    %c0_13 = arith.constant 0 : index
    %c0_14 = arith.constant 0 : index
    %12 = vector.load %arg7[%c0_13, %c0_14] : memref<32x8xf32, #tpu.memory_space<vmem>>, vector<32x8xf32>
    %c0_15 = arith.constant 0 : index
    %c0_16 = arith.constant 0 : index
    %13 = vector.load %arg8[%c0_15, %c0_16] : memref<32x1xf32, #tpu.memory_space<vmem>>, vector<32x1xf32>
    %c0_17 = arith.constant 0 : index
    %c0_18 = arith.constant 0 : index
    %14 = vector.load %arg9[%c0_17, %c0_18] : memref<8x32xf32, #tpu.memory_space<vmem>>, vector<8x32xf32>
    %c0_19 = arith.constant 0 : index
    %c0_20 = arith.constant 0 : index
    %15 = vector.load %arg10[%c0_19, %c0_20] : memref<8x1xf32, #tpu.memory_space<vmem>>, vector<8x1xf32>
    %cst = arith.constant dense<0.000000e+00> : vector<32x128xf32>
    %16 = tpu.matmul %12, %2, %cst {dimension_numbers = #tpu.dot_dimension_numbers<[1], [0], [0], [1], [0, 0, 1, 1], [], []>} : vector<32x8xf32>, vector<8x128xf32>, vector<32x128xf32> -> vector<32x128xf32>
    %17 = vector.broadcast %10 : vector<32x1xf32> to vector<32x128xf32>
    %18 = arith.addf %16, %17 : vector<32x128xf32>
    %19 = vector.broadcast %15 : vector<8x1xf32> to vector<8x128xf32>
    %20 = vector.broadcast %8 : vector<1x128xf32> to vector<8x128xf32>
    %21 = arith.mulf %19, %20 : vector<8x128xf32>
    %cst_21 = arith.constant dense<0.000000e+00> : vector<32x128xf32>
    %22 = tpu.matmul %11, %5, %cst_21 {dimension_numbers = #tpu.dot_dimension_numbers<[1], [0], [0], [1], [0, 0, 1, 1], [], []>} : vector<32x8xf32>, vector<8x128xf32>, vector<32x128xf32> -> vector<32x128xf32>
    %23 = arith.addf %22, %18 : vector<32x128xf32>
    %24 = arith.negf %23 : vector<32x128xf32>
    %25 = math.exp %24 : vector<32x128xf32>
    %cst_22 = arith.constant 1.000000e+00 : f32
    %26 = vector.broadcast %cst_22 : f32 to vector<32x128xf32>
    %27 = arith.addf %26, %25 : vector<32x128xf32>
    %28 = arith.divf %26, %27 : vector<32x128xf32>
    %29 = arith.mulf %23, %28 : vector<32x128xf32>
    %cst_23 = arith.constant dense<0.000000e+00> : vector<8x128xf32>
    %30 = tpu.matmul %14, %29, %cst_23 {dimension_numbers = #tpu.dot_dimension_numbers<[1], [0], [0], [1], [0, 0, 1, 1], [], []>} : vector<8x32xf32>, vector<32x128xf32>, vector<8x128xf32> -> vector<8x128xf32>
    %31 = vector.broadcast %8 : vector<1x128xf32> to vector<8x128xf32>
    %32 = arith.mulf %30, %31 : vector<8x128xf32>
    %33 = arith.addf %5, %32 : vector<8x128xf32>
    %34 = arith.addf %33, %21 : vector<8x128xf32>
    %cst_24 = arith.constant 2.000000e-01 : f32
    %35 = vector.broadcast %cst_24 : f32 to vector<32x1xf32>
    %36 = arith.mulf %13, %35 : vector<32x1xf32>
    %37 = vector.broadcast %36 : vector<32x1xf32> to vector<32x128xf32>
    %38 = arith.addf %18, %37 : vector<32x128xf32>
    %cst_25 = arith.constant dense<0.000000e+00> : vector<32x128xf32>
    %39 = tpu.matmul %11, %34, %cst_25 {dimension_numbers = #tpu.dot_dimension_numbers<[1], [0], [0], [1], [0, 0, 1, 1], [], []>} : vector<32x8xf32>, vector<8x128xf32>, vector<32x128xf32> -> vector<32x128xf32>
    %40 = arith.addf %39, %38 : vector<32x128xf32>
    %41 = arith.negf %40 : vector<32x128xf32>
    %42 = math.exp %41 : vector<32x128xf32>
    %cst_26 = arith.constant 1.000000e+00 : f32
    %43 = vector.broadcast %cst_26 : f32 to vector<32x128xf32>
    %44 = arith.addf %43, %42 : vector<32x128xf32>
    %45 = arith.divf %43, %44 : vector<32x128xf32>
    %46 = arith.mulf %40, %45 : vector<32x128xf32>
    %cst_27 = arith.constant dense<0.000000e+00> : vector<8x128xf32>
    %47 = tpu.matmul %14, %46, %cst_27 {dimension_numbers = #tpu.dot_dimension_numbers<[1], [0], [0], [1], [0, 0, 1, 1], [], []>} : vector<8x32xf32>, vector<32x128xf32>, vector<8x128xf32> -> vector<8x128xf32>
    %48 = vector.broadcast %8 : vector<1x128xf32> to vector<8x128xf32>
    %49 = arith.mulf %47, %48 : vector<8x128xf32>
    %50 = arith.addf %34, %49 : vector<8x128xf32>
    %51 = arith.addf %50, %21 : vector<8x128xf32>
    %cst_28 = arith.constant 4.000000e-01 : f32
    %52 = vector.broadcast %cst_28 : f32 to vector<32x1xf32>
    %53 = arith.mulf %13, %52 : vector<32x1xf32>
    %54 = vector.broadcast %53 : vector<32x1xf32> to vector<32x128xf32>
    %55 = arith.addf %18, %54 : vector<32x128xf32>
    %cst_29 = arith.constant dense<0.000000e+00> : vector<32x128xf32>
    %56 = tpu.matmul %11, %51, %cst_29 {dimension_numbers = #tpu.dot_dimension_numbers<[1], [0], [0], [1], [0, 0, 1, 1], [], []>} : vector<32x8xf32>, vector<8x128xf32>, vector<32x128xf32> -> vector<32x128xf32>
    %57 = arith.addf %56, %55 : vector<32x128xf32>
    %58 = arith.negf %57 : vector<32x128xf32>
    %59 = math.exp %58 : vector<32x128xf32>
    %cst_30 = arith.constant 1.000000e+00 : f32
    %60 = vector.broadcast %cst_30 : f32 to vector<32x128xf32>
    %61 = arith.addf %60, %59 : vector<32x128xf32>
    %62 = arith.divf %60, %61 : vector<32x128xf32>
    %63 = arith.mulf %57, %62 : vector<32x128xf32>
    %cst_31 = arith.constant dense<0.000000e+00> : vector<8x128xf32>
    %64 = tpu.matmul %14, %63, %cst_31 {dimension_numbers = #tpu.dot_dimension_numbers<[1], [0], [0], [1], [0, 0, 1, 1], [], []>} : vector<8x32xf32>, vector<32x128xf32>, vector<8x128xf32> -> vector<8x128xf32>
    %65 = vector.broadcast %8 : vector<1x128xf32> to vector<8x128xf32>
    %66 = arith.mulf %64, %65 : vector<8x128xf32>
    %67 = arith.addf %51, %66 : vector<8x128xf32>
    %68 = arith.addf %67, %21 : vector<8x128xf32>
    %cst_32 = arith.constant 6.000000e-01 : f32
    %69 = vector.broadcast %cst_32 : f32 to vector<32x1xf32>
    %70 = arith.mulf %13, %69 : vector<32x1xf32>
    %71 = vector.broadcast %70 : vector<32x1xf32> to vector<32x128xf32>
    %72 = arith.addf %18, %71 : vector<32x128xf32>
    %cst_33 = arith.constant dense<0.000000e+00> : vector<32x128xf32>
    %73 = tpu.matmul %11, %68, %cst_33 {dimension_numbers = #tpu.dot_dimension_numbers<[1], [0], [0], [1], [0, 0, 1, 1], [], []>} : vector<32x8xf32>, vector<8x128xf32>, vector<32x128xf32> -> vector<32x128xf32>
    %74 = arith.addf %73, %72 : vector<32x128xf32>
    %75 = arith.negf %74 : vector<32x128xf32>
    %76 = math.exp %75 : vector<32x128xf32>
    %cst_34 = arith.constant 1.000000e+00 : f32
    %77 = vector.broadcast %cst_34 : f32 to vector<32x128xf32>
    %78 = arith.addf %77, %76 : vector<32x128xf32>
    %79 = arith.divf %77, %78 : vector<32x128xf32>
    %80 = arith.mulf %74, %79 : vector<32x128xf32>
    %cst_35 = arith.constant dense<0.000000e+00> : vector<8x128xf32>
    %81 = tpu.matmul %14, %80, %cst_35 {dimension_numbers = #tpu.dot_dimension_numbers<[1], [0], [0], [1], [0, 0, 1, 1], [], []>} : vector<8x32xf32>, vector<32x128xf32>, vector<8x128xf32> -> vector<8x128xf32>
    %82 = vector.broadcast %8 : vector<1x128xf32> to vector<8x128xf32>
    %83 = arith.mulf %81, %82 : vector<8x128xf32>
    %84 = arith.addf %68, %83 : vector<8x128xf32>
    %85 = arith.addf %84, %21 : vector<8x128xf32>
    %cst_36 = arith.constant 8.000000e-01 : f32
    %86 = vector.broadcast %cst_36 : f32 to vector<32x1xf32>
    %87 = arith.mulf %13, %86 : vector<32x1xf32>
    %88 = vector.broadcast %87 : vector<32x1xf32> to vector<32x128xf32>
    %89 = arith.addf %18, %88 : vector<32x128xf32>
    %cst_37 = arith.constant dense<0.000000e+00> : vector<32x128xf32>
    %90 = tpu.matmul %11, %85, %cst_37 {dimension_numbers = #tpu.dot_dimension_numbers<[1], [0], [0], [1], [0, 0, 1, 1], [], []>} : vector<32x8xf32>, vector<8x128xf32>, vector<32x128xf32> -> vector<32x128xf32>
    %91 = arith.addf %90, %89 : vector<32x128xf32>
    %92 = arith.negf %91 : vector<32x128xf32>
    %93 = math.exp %92 : vector<32x128xf32>
    %cst_38 = arith.constant 1.000000e+00 : f32
    %94 = vector.broadcast %cst_38 : f32 to vector<32x128xf32>
    %95 = arith.addf %94, %93 : vector<32x128xf32>
    %96 = arith.divf %94, %95 : vector<32x128xf32>
    %97 = arith.mulf %91, %96 : vector<32x128xf32>
    %cst_39 = arith.constant dense<0.000000e+00> : vector<8x128xf32>
    %98 = tpu.matmul %14, %97, %cst_39 {dimension_numbers = #tpu.dot_dimension_numbers<[1], [0], [0], [1], [0, 0, 1, 1], [], []>} : vector<8x32xf32>, vector<32x128xf32>, vector<8x128xf32> -> vector<8x128xf32>
    %99 = vector.broadcast %8 : vector<1x128xf32> to vector<8x128xf32>
    %100 = arith.mulf %98, %99 : vector<8x128xf32>
    %101 = arith.addf %85, %100 : vector<8x128xf32>
    %102 = arith.addf %101, %21 : vector<8x128xf32>
    %c0_40 = arith.constant 0 : index
    %c0_41 = arith.constant 0 : index
    %c0_42 = arith.constant 0 : index
    %103 = vector.load %arg11[%c0_40, %c0_41, %c0_42] : memref<1x8x128xf32, #tpu.memory_space<vmem>>, vector<1x8x128xf32>
    %104 = vector.shape_cast %103 : vector<1x8x128xf32> to vector<8x128xf32>
    %105 = vector.shape_cast %102 : vector<8x128xf32> to vector<1x8x128xf32>
    tpu.vector_store %arg11[%c0_40, %c0_41, %c0_42], %105 {strides = array<i32>} : memref<1x8x128xf32, #tpu.memory_space<vmem>>, vector<1x8x128xf32>,
    return
  }
  func.func @transform_0(%arg0: i32, %arg1: i32) -> (i32, i32, i32) {
    %c0_i32 = arith.constant 0 : i32
    %c0_i32_0 = arith.constant 0 : i32
    return %arg0, %c0_i32, %arg1 : i32, i32, i32
  }
  func.func @transform_1(%arg0: i32, %arg1: i32) -> (i32, i32, i32) {
    %c0_i32 = arith.constant 0 : i32
    %c0_i32_0 = arith.constant 0 : i32
    return %arg0, %c0_i32, %arg1 : i32, i32, i32
  }
  func.func @transform_2(%arg0: i32, %arg1: i32) -> (i32, i32, i32) {
    %c0_i32 = arith.constant 0 : i32
    %c0_i32_0 = arith.constant 0 : i32
    return %arg0, %c0_i32, %arg1 : i32, i32, i32
  }
  func.func @transform_3(%arg0: i32, %arg1: i32) -> (i32, i32, i32) {
    %c0_i32 = arith.constant 0 : i32
    %c0_i32_0 = arith.constant 0 : i32
    %c0_i32_1 = arith.constant 0 : i32
    return %arg0, %c0_i32, %c0_i32_0 : i32, i32, i32
  }
  func.func @transform_4(%arg0: i32, %arg1: i32) -> (i32, i32) {
    %c0_i32 = arith.constant 0 : i32
    %c0_i32_0 = arith.constant 0 : i32
    %c0_i32_1 = arith.constant 0 : i32
    return %c0_i32, %c0_i32_0 : i32, i32
  }
  func.func @transform_5(%arg0: i32, %arg1: i32) -> (i32, i32) {
    %c0_i32 = arith.constant 0 : i32
    %c0_i32_0 = arith.constant 0 : i32
    %c0_i32_1 = arith.constant 0 : i32
    return %c0_i32, %c0_i32_0 : i32, i32
  }
  func.func @transform_6(%arg0: i32, %arg1: i32) -> (i32, i32) {
    %c0_i32 = arith.constant 0 : i32
    %c0_i32_0 = arith.constant 0 : i32
    %c0_i32_1 = arith.constant 0 : i32
    return %c0_i32, %c0_i32_0 : i32, i32
  }
  func.func @transform_7(%arg0: i32, %arg1: i32) -> (i32, i32) {
    %c0_i32 = arith.constant 0 : i32
    %c0_i32_0 = arith.constant 0 : i32
    %c0_i32_1 = arith.constant 0 : i32
    return %c0_i32, %c0_i32_0 : i32, i32
  }
  func.func @transform_8(%arg0: i32, %arg1: i32) -> (i32, i32) {
    %c0_i32 = arith.constant 0 : i32
    %c0_i32_0 = arith.constant 0 : i32
    %c0_i32_1 = arith.constant 0 : i32
    return %c0_i32, %c0_i32_0 : i32, i32
  }
  func.func @transform_9(%arg0: i32, %arg1: i32) -> (i32, i32, i32) {
    %c0_i32 = arith.constant 0 : i32
    %c0_i32_0 = arith.constant 0 : i32
    return %arg0, %c0_i32, %arg1 : i32, i32, i32
  }
}

</mosaic_0001>

<bundles_post_ra>
// kernel: tpu_custom_call.1
= control target key start
LH: loop header
LB: loop body
LE: loop exit
PB: predicated region body
PF: predicated region fallthrough
CT: control target
= control target key end

     0   :  { %14 = vsyncpa [#allocation3], 0  ;;  %s2595_s0 = inlined_call_operand.vmem [shape: bf16[2,8,128], index: 0, kind: input, shape index: {}]   ;;  %s2596_s1 = inlined_call_operand.vmem [shape: bf16[2,8,128], index: 1, kind: input, shape index: {}]   ;;  %s2597_s2 = inlined_call_operand.vmem [shape: bf16[2,1,128], index: 2, kind: input, shape index: {}]   ;;  %s2598_s3 = inlined_call_operand.vmem [shape: f32[2,32,1], index: 3, kind: input, shape index: {}]   ;;  %s2599_s4 = inlined_call_operand.vmem [shape: f32[32,8], index: 4, kind: input, shape index: {}]   ;;  %s2600_s5 = inlined_call_operand.vmem [shape: f32[32,8], index: 5, kind: input, shape index: {}]   ;;  %s2601_s6 = inlined_call_operand.vmem [shape: f32[32,1], index: 6, kind: input, shape index: {}]   ;;  %s2602_s7 = inlined_call_operand.vmem [shape: f32[8,32], index: 7, kind: input, shape index: {}]   ;;  %s2603_s8 = inlined_call_operand.vmem [shape: f32[8,1], index: 8, kind: input, shape index: {}]   ;;  %s2604_s9 = inlined_call_operand.hbm [shape: f32[2,8,128], index: 9, kind: output, shape index: {}]  }
   0x1   :  { %16 = vsyncpa [#allocation3 + $0x1], 0  ;;  %s2290_s30 = smov 0   ;;  %s2292_s10 = smov 0  }
   0x2   :  { %s2294_s11 = smov 0   ;;  %s2296_s12 = smov 0  }
   0x3   :  { %s2298_s13 = smov 0   ;;  %s2300_s14 = smov 0  }
   0x4 LB: > { %2607 = sst [smem:[#allocation5_spill]] %s2229_s13  ;;  %s1762_s15 = sadd.s32 4294967295, %s2233_s14   ;;  %s2233_s14 = sphi %s2300_s14, %s22_s14   ;;  %s2229_s13 = sphi %s2298_s13, %s2614_s13   ;;  %s2225_s12 = sphi %s2296_s12, %s2613_s12   ;;  %s2221_s11 = sphi %s2294_s11, %s2617_s11   ;;  %s2217_s10 = sphi %s2292_s10, %s2616_s10   ;;  %s2213_s30 = sphi %s2290_s30, %s2615_s30  }
   0x5   : > { %s1763_s16 = sadd.s32 4294967294, %s2233_s14   ;;  %s34_s17 = sadd.s32 1, %s2229_s13 }
   0x6   : > { %s258_s18 = sadd.s32 1, %s2221_s11  ;;  %p36_p0 = scmp.ge.s32.totalorder %s34_s17, 2 }
   0x7   : > { %p268_p1 = scmp.ne.s32.totalorder %s2221_s11, %s2217_s10  ;;  %p269_p2 = scmp.eq.s32.totalorder %s1762_s15, 1 }
   0x8   : > { %p274_p3 = scmp.ne.s32.totalorder %s2217_s10, %s2213_s30  ;;  %s2619_s17 = smov (%p36_p0, %s34_s17), 0 }
   0x9   : > { %2608 = sst [smem:[#allocation6_spill]] %s2619_s17  ;;  %p2330_p4 = por %p269_p2, %p268_p1 }
   0xa   : > { %p275_p5 = scmp.eq.s32.totalorder %s1763_s16, 1  ;;  %s253_s20 = ssub.s32 %s2229_s13, %s2619_s17 }
   0xb   : > { %p1766_p6 = scmp.ge.s32.totalorder %s2233_s14, 1  ;;  %p256_p7 = scmp.eq.s32.totalorder %s253_s20, 0 }
   0xc   : > { %p2337_p8 = por %p275_p5, %p274_p3  ;;  %p345_p9 = scmp.lt.s32.totalorder %s2233_s14, 3 }
   0xd   : > { %s2343_s22 = scalar_select %p256_p7, %s2221_s11, %s258_s18  }
   0xe   : > { %p346_p10 = pnand %p1766_p6, %p345_p9 }
   0xf   : > { %2611 = sst [smem:[#allocation7_spill]] %s2343_s22  ;;  %p401_p11 = scmp.lt.s32.totalorder (!%p346_p10), %s2225_s12, 1  ;;  %v440_v0 = vld [vmem:[%s2600_s5] sm:$0xff] (!%p346_p10)  ;;  %vm470_vm0 = vcmask (!%p346_p10), 64512   ;;  %v2235_v2 = vmov (!%p346_p10), 0   ;;  %v441_v7 = vld [vmem:[%s2600_s5 + $0x8] sm:$0xff] (!%p346_p10) }
  0x10   : > { %349 = sbr.rel (%p346_p10) target bundleno = 2406 (0x966), region = 56  ;;  %v2352_v1 = vld [vmem:[%s2599_s4] sm:$0xff] (!%p346_p10)  ;;  %1883 = vmatprep.mubr.msk.f32.mxu0 (!%p346_p10), %vm470_vm0, %v440_v0  ;;  %2073 = vset.pattern.permute.xlu0 (!%p346_p10), %v2235_v2  ;;  %v2379_v8 = vld [vmem:[%s2599_s4 + $0x8] sm:$0xff] (!%p346_p10)  ;;  %v442_v9 = vld [vmem:[%s2600_s5 + $0x10] sm:$0xff] (!%p346_p10)  ;;  %v2236_v38 = vmov (!%p346_p10), 0.0|0.0   ;;  %vm2237_vm1 = vmmov (!%p346_p10), 0  }
  0x11   : > { %1891 = vmatprep.mubr.msk.f32.mxu1 (!%p346_p10), %vm470_vm0, %v2352_v1  ;;  %2074 = vset.pattern.permute.xlu1 (!%p346_p10), %v2235_v2  ;;  %v2388_v10 = vld [vmem:[%s2599_s4 + $0x10] sm:$0xff] (!%p346_p10)  ;;  %v443_v13 = vld [vmem:[%s2600_s5 + $0x18] sm:$0xff] (!%p346_p10)  ;;  %v444_v17 = vld [vmem:[%s2601_s6] sm:$0xff] (!%p346_p10)  ;;  %v2238_v39 = vmov (!%p346_p10), 0.0   ;;  %vm703_vm2 = vcmask (!%p346_p10), 261120   ;;  %s1822_s15 = sshll.u32 (!%p346_p10), %s2225_s12, 7 }
  0x12   : > { %v2403_v14 = vld [vmem:[%s2599_s4 + $0x18] sm:$0xff] (!%p346_p10)  ;;  %v780_v18 = vmul.f32 (!%p346_p10), 0.2, %v444_v17  ;;  %v449_v19 = vld [vmem:[%s2603_s8] sm:$0xff] (!%p346_p10)  ;;  %v445_v20 = vld [vmem:[%s2601_s6 + $0x8] sm:$0xff] (!%p346_p10)  ;;  %s2548_s20 = scalar_lea.hbm (!%p346_p10), %s2604_s9, %s1822_s15 }
  0x13   : > { %v446_v21 = vld [vmem:[%s2601_s6 + $0x10] sm:$0xff] (!%p346_p10)  ;;  %v781_v22 = vmul.f32 (!%p346_p10), 0.2, %v445_v20  ;;  %v447_v24 = vld [vmem:[%s2601_s6 + $0x18] sm:$0xff] (!%p346_p10)  ;;  %v994_v26 = vmul.f32 (!%p346_p10), 0.4, %v444_v17 }
  0x14   : > { %v782_v23 = vmul.f32 (!%p346_p10), 0.2, %v446_v21  ;;  %v783_v25 = vmul.f32 (!%p346_p10), 0.2, %v447_v24  ;;  %v995_v27 = vmul.f32 (!%p346_p10), 0.4, %v445_v20 }
  0x15   : > { %v996_v28 = vmul.f32 (!%p346_p10), 0.4, %v446_v21  ;;  %v997_v29 = vmul.f32 (!%p346_p10), 0.4, %v447_v24  ;;  %v1208_v30 = vmul.f32 (!%p346_p10), 0.6, %v444_v17 }
  0x16   : > { %v1209_v31 = vmul.f32 (!%p346_p10), 0.6, %v445_v20  ;;  %v1210_v32 = vmul.f32 (!%p346_p10), 0.6, %v446_v21  ;;  %v1211_v33 = vmul.f32 (!%p346_p10), 0.6, %v447_v24 }
  0x17   : > { %s2358_s27 = scalar_select %p401_p11, %s2225_s12, 1  ;;  %v1422_v34 = vmul.f32 0.8, %v444_v17  ;;  %v1423_v35 = vmul.f32 0.8, %v445_v20 }
  0x18   : > { %v1424_v36 = vmul.f32 0.8, %v446_v21  ;;  %v1425_v37 = vmul.f32 0.8, %v447_v24  ;;  %v573_v24 = vlaneseq  ;;  %s2239_s12 = smov [#allocation2]  }
  0x19   : > { %s1768_s28 = sshll.u32 %s2358_s27, 2  ;;  %s1825_s24 = sshll.u32 %s2358_s27, 5 }
  0x1a   : > { %s407_s16 = scalar_lea.vmem %s2595_s0, %s1768_s28  ;;  %s414_s23 = scalar_lea.vmem %s2596_s1, %s1768_s28 }
  0x1b   : > { %v426_v3 = vld [vmem:[%s407_s16] sm:$0xf]  ;;  %s425_s17 = scalar_lea.vmem %s2598_s3, %s1825_s24  ;;  %s420_s26 = scalar_lea.vmem %s2597_s2, %s2358_s27 }
  0x1c   : > { %v428_v4 = vld [vmem:[%s414_s23] sm:$0xf]  ;;  %v427_v5 = vunpack.c.l.bf16 %v426_v3  ;;  %v434_v12 = vld [vmem:[%s425_s17 + $0x10] sm:$0xff]  ;;  %v433_v15 = vld [vmem:[%s425_s17 + $0x8] sm:$0xff]  ;;  %s398_s27 = sand.u32 1, %s2217_s10   ;;  %s2159_s23 = sshll.u32 %s2239_s12, 4  ;;  %s2160_s23 = int_to_ptr.vmem [resolvable:$false] %s2159_s23 }
  0x1d   : > { %v2368_v6 = vunpack.c.l.bf16 %v428_v4  ;;  %v432_v11 = vld [vmem:[%s425_s17] sm:$0xff]  ;;  %462 = vperm.xlu1 %2074, %v434_v12   ;;  %v435_v16 = vld [vmem:[%s425_s17 + $0x18] sm:$0xff]  ;;  %s1767_s29 = sshll.u32 %s398_s27, 3  ;;  %s1638_s13 = scalar_lea.sflag [#allocation3], %s398_s27 }
  0x1e   : > { %1881 = vmatprep.subr.mxu0 %v427_v5  ;;  %452 = vperm.xlu0 %2073, %v432_v11   ;;  %s400_s17 = scalar_lea.vmem [#allocation2], %s1767_s29  ;;  %s2161_s24 = scalar_lea.vmem %s2160_s23, 256 }
  0x1f   : > { %1889 = vmatprep.subr.mxu1 %v2368_v6  ;;  %1882 = vmatpush3.msra.mxu0 %v427_v5  ;;  %s1652_s28 = sshll.u32 %s400_s17, 4  ;;  %s2550_s28 = int_to_ptr.vmem [resolvable:$true] %s1652_s28 }
  0x20   : > { %1890 = vmatpush3.msra.mxu1 %v2368_v6  ;;  %1884 = vmatmul.mubr.msk.f32.vlgmr.msra.gmra.mrb[0].mxu0 %vm470_vm0, %v441_v7  ;;  %s2155_s22 = scalar_lea.vmem %s2550_s28, 128  ;;  %p2162_p1 = scmp.lt.s32.totalorder %s2550_s28, %s2160_s23 }
  0x21   : > { %1892 = vmatmul.mubr.msk.f32.vlgmr.msra.gmra.mrb[0].mxu1 %vm470_vm0, %v2379_v8  ;;  %1886 = vmatprep.mubr.msk.f32.mxu0 %vm470_vm0, %v442_v9  ;;  %p2156_p12 = scmp.ne.s32.totalorder %s2550_s28, %s2155_s22  ;;  %p2163_p2 = scmp.lt.s32.totalorder %s2161_s24, %s2155_s22 }
  0x22   : > { %1894 = vmatprep.mubr.msk.f32.mxu1 %vm470_vm0, %v2388_v10  ;;  %457 = vperm.xlu0 %2073, %v433_v15  }
  0x23   : > { %467 = vperm.xlu1 %2074, %v435_v16   ;;  %1984 = vmatprep.subr.bf16.mxu0 %v2236_v38  ;;  %p2157_p13 = pnand %p2156_p12, %p2330_p4  ;;  %p2164_p3 = por %p2163_p2, %p2162_p1 }
  0x24   : > { %1887 = vmatmul.mubr.msk.f32.gmra.mrb[2].mxu0 %vm470_vm0, %v443_v13 }
  0x25   : > { %1895 = vmatmul.mubr.msk.f32.gmra.mrb[2].mxu1 %vm470_vm0, %v2403_v14  ;;  %1905 = vmatprep.mubr.msk.f32.mxu0 %vm2237_vm1, %v2238_v39  ;;  %p2158_p0 = pneg %p2157_p13 }
  0x26   : > { %1910 = vmatprep.mubr.msk.f32.mxu1 %vm470_vm0, %v2352_v1  ;;  %570 = vperm.xlu0 %2073, %v449_v19  }
  0x27   : > { %786 = vperm.xlu1 %2074, %v780_v18   ;;  %p2165_p5 = pnand %p2164_p3, %p2158_p0 }
  0x2a   : > { %791 = vperm.xlu0 %2073, %v781_v22  }
  0x2b   : > { %796 = vperm.xlu1 %2074, %v782_v23   ;;  %v2444_v23 = vld [vmem:[%s2602_s7] sm:$0xff] }
  0x2e   : > { %801 = vperm.xlu0 %2073, %v783_v25   ;;  %v574_v25 = vshrl.u32 %v573_v24, 7 }
  0x2f   : > { %1000 = vperm.xlu1 %2074, %v994_v26   ;;  %v430_v26 = vld [vmem:[%s420_s26] sm:$0x1] }
  0x32   : > { %1005 = vperm.xlu0 %2073, %v995_v27   ;;  %v431_v27 = vunpack.c.l.bf16 %v430_v26 }
  0x33   : > { %1010 = vperm.xlu1 %2074, %v996_v28   ;;  %v575_v28 = vsub.s32 0, %v574_v25 }
  0x36   : > { %1015 = vperm.xlu0 %2073, %v997_v29   ;;  %v2455_v29 = vrot.slane %v431_v27, %v575_v28 }
  0x37   : > { %1214 = vperm.xlu1 %2074, %v1208_v30  }
  0x3a   : > { %1219 = vperm.xlu0 %2073, %v1209_v31  }
  0x3b   : > { %1224 = vperm.xlu1 %2074, %v1210_v32  }
  0x3e   : > { %1229 = vperm.xlu0 %2073, %v1211_v33  }
  0x3f   : > { %1428 = vperm.xlu1 %2074, %v1422_v34  }
  0x42   : > { %1433 = vperm.xlu0 %2073, %v1423_v35  }
  0x43   : > { %1438 = vperm.xlu1 %2074, %v1424_v36  }
  0x46   : > { %1443 = vperm.xlu0 %2073, %v1425_v37  }
  0x9c   : > { %v463_v41 = vpop.permute.xlu1 %462 }
  0x9d   : > { %v453_v40 = vpop.permute.xlu0 %452 }
  0xa1   : > { %v458_v42 = vpop.permute.xlu0 %457 }
  0xa2   : > { %v468_v49 = vpop.permute.xlu1 %467 }
  0xa5   : > { %v571_v33 = vpop.permute.xlu0 %570 }
  0xa6   : > { %v2459_v34 = vmul.f32 %v2455_v29, %v571_v33 }
  0xa9   : > { %v792_v37 = vpop.permute.xlu0 %791 }
  0xf3   : > { %v1885_v43 = vpop.f32.mrb[0].mxu0 }
  0xf4   : > { %v1893_v44 = vpop.f32.mrb[0].mxu1  ;;  %v2428_v45 = vadd.f32 %v1885_v43, %v458_v42  ;;  %v549_v46 = vpop.f32.mrb[1].mxu0 }
  0xf5   : > { %v656_v47 = vpop.f32.mrb[1].mxu1  ;;  %v2430_v48 = vadd.f32 %v549_v46, %v453_v40  ;;  %v787_v40 = vpop.permute.xlu1 %786 }
  0xf6   : > { %v662_v50 = vadd.f32 %v1893_v44, %v2428_v45  ;;  %v802_v46 = vpop.permute.xlu0 %801 }
  0xf7   : > { %v657_v51 = vadd.f32 %v656_v47, %v2430_v48  ;;  %v1888_v52 = vpop.f32.mrb[2].mxu0  ;;  %v804_v42 = vadd.f32 %v787_v40, %v2430_v48 }
  0xf8   : > { %v1896_v53 = vpop.f32.mrb[2].mxu1  ;;  %v1781_v54 = vmul.f32 -1.442695, %v662_v50  ;;  %v2434_v55 = vadd.f32 %v1888_v52, %v468_v49  ;;  %v559_v56 = vpop.f32.mrb[3].mxu0 }
  0xf9   : > { %v666_v57 = vpop.f32.mrb[3].mxu1  ;;  %v1780_v58 = vmul.f32 -1.442695, %v657_v51  ;;  %v2436_v59 = vadd.f32 %v559_v56, %v463_v41  ;;  %v797_v49 = vpop.permute.xlu1 %796 }
  0xfa   : > { %2075 = vpow2.f32 %v1781_v54  ;;  %v672_v60 = vadd.f32 %v1896_v53, %v2434_v55  ;;  %v1006_v27 = vpop.permute.xlu0 %1005 }
  0xfb   : > { %2077 = vpow2.f32 %v1780_v58  ;;  %v667_v61 = vadd.f32 %v666_v57, %v2436_v59  ;;  %v806_v54 = vadd.f32 %v797_v49, %v2436_v59 }
  0xfc   : > { %v1783_v62 = vmul.f32 -1.442695, %v672_v60 }
  0xfd   : > { %v1782_v63 = vmul.f32 -1.442695, %v667_v61  ;;  %v1001_v28 = vpop.permute.xlu1 %1000 }
  0xfe   : > { %2079 = vpow2.f32 %v1783_v62 }
  0xff   : > { %2081 = vpow2.f32 %v1782_v63 }
 0x101   : > { %v1011_v40 = vpop.permute.xlu1 %1010 }
 0x104   : > { %v2076_v0 = vpop.eup %2075 }
 0x105   : > { %v2078_v2 = vpop.eup %2077  ;;  %v688_v3 = vadd.f32 1.0, %v2076_v0 }
 0x106   : > { %v687_v4 = vadd.f32 1.0, %v2078_v2 }
 0x107   : > { %2083 = vrcp.f32 %v688_v3 }
 0x108   : > { %v2080_v5 = vpop.eup %2079  ;;  %2085 = vrcp.f32 %v687_v4 }
 0x109   : > { %v2082_v7 = vpop.eup %2081  ;;  %v690_v9 = vadd.f32 1.0, %v2080_v5 }
 0x10a   : > { %v689_v11 = vadd.f32 1.0, %v2082_v7 }
 0x10b   : > { %2087 = vrcp.f32 %v690_v9 }
 0x10c   : > { %2089 = vrcp.f32 %v689_v11 }
 0x111   : > { %v2084_v12 = vpop.eup %2083 }
 0x112   : > { %v2086_v13 = vpop.eup %2085  ;;  %v700_v15 = vmul.f32 %v2084_v12, %v662_v50 }
 0x113   : > { %v699_v16 = vmul.f32 %v2086_v13, %v657_v51  ;;  %v807_v51 = vadd.f32 %v802_v46, %v2434_v55 }
 0x115   : > { %v2088_v17 = vpop.eup %2087  ;;  %v1985_v18 = vpack.c.bf16 %v700_v15, %v699_v16 }
 0x116   : > { %v2090_v19 = vpop.eup %2089  ;;  %v702_v20 = vmul.f32 %v2088_v17, %v672_v60 }
 0x117   : > { %v701_v21 = vmul.f32 %v2090_v19, %v667_v61  ;;  %1986 = vmatpush3.bf16.msra.mxu0 %v1985_v18 }
 0x118   : > { %1987 = vmatprep.subr.bf16.mxu0 %v2236_v38 }
 0x119   : > { %v1988_v22 = vpack.c.bf16 %v702_v20, %v701_v21 }
 0x11b   : > { %1989 = vmatpush3.bf16.msra.mxu0 %v1988_v22 }
 0x11c   : > { %1990 = vmatprep.subr.bf16.mxu0 %v2236_v38 }
 0x11e   : > { %1906 = vmatmul.mubr.msk.f32.vlgmr.msra.gmra.mrb[4].mxu0 %vm703_vm2, %v2444_v23 }
 0x11f   : > { %1924 = vmatprep.mubr.msk.f32.mxu0 %vm2237_vm1, %v2238_v39 }
 0x1f1   : > { %v773_v30 = vpop.f32.mrb[4].mxu0 }
 0x1f2   : > { %v777_v31 = vmul.f32 %v773_v30, %v2455_v29  ;;  %v1907_v32 = vpop.f32.mrb[5].mxu0  ;;  %v1019_v30 = vadd.f32 %v1006_v27, %v2428_v45 }
 0x1f3   : > { %v1018_v32 = vadd.f32 %v1001_v28, %v2430_v48 }
 0x1f4   : > { %v778_v35 = vadd.f32 %v777_v31, %v2368_v6  ;;  %v805_v6 = vadd.f32 %v792_v37, %v2428_v45 }
 0x1f6   : > { %v779_v36 = vadd.f32 %v778_v35, %v2459_v34 }
 0x1f8   : > { %1908 = vmatprep.subr.mxu1 %v779_v36 }
 0x1f9   : > { %1909 = vmatpush3.msra.mxu1 %v779_v36 }
 0x1fa   : > { %1911 = vmatmul.mubr.msk.f32.vlgmr.msra.gmra.mrb[4].mxu1 %vm470_vm0, %v2379_v8 }
 0x1fb   : > { %1913 = vmatprep.mubr.msk.f32.mxu1 %vm470_vm0, %v2388_v10 }
 0x1fe   : > { %1914 = vmatmul.mubr.msk.f32.gmra.mrb[6].mxu1 %vm470_vm0, %v2403_v14 }
 0x1ff   : > { %1929 = vmatprep.mubr.msk.f32.mxu1 %vm470_vm0, %v2352_v1 }
 0x2cd   : > { %v1912_v41 = vpop.f32.mrb[4].mxu1 }
 0x2ce   : > { %v880_v43 = vadd.f32 %v1912_v41, %v805_v6  ;;  %v874_v44 = vpop.f32.mrb[5].mxu1 }
 0x2cf   : > { %v875_v47 = vadd.f32 %v874_v44, %v804_v42  ;;  %v1020_v44 = vadd.f32 %v1011_v40, %v2436_v59 }
 0x2d0   : > { %v1790_v50 = vmul.f32 -1.442695, %v880_v43 }
 0x2d1   : > { %v1789_v52 = vmul.f32 -1.442695, %v875_v47  ;;  %v1915_v53 = vpop.f32.mrb[6].mxu1 }
 0x2d2   : > { %2091 = vpow2.f32 %v1790_v50  ;;  %v890_v56 = vadd.f32 %v1915_v53, %v807_v51  ;;  %v884_v57 = vpop.f32.mrb[7].mxu1 }
 0x2d3   : > { %2093 = vpow2.f32 %v1789_v52  ;;  %v885_v58 = vadd.f32 %v884_v57, %v806_v54 }
 0x2d4   : > { %v1792_v60 = vmul.f32 -1.442695, %v890_v56 }
 0x2d5   : > { %v1791_v61 = vmul.f32 -1.442695, %v885_v58 }
 0x2d6   : > { %2095 = vpow2.f32 %v1792_v60 }
 0x2d7   : > { %2097 = vpow2.f32 %v1791_v61 }
 0x2dc   : > { %v2092_v62 = vpop.eup %2091 }
 0x2dd   : > { %v2094_v63 = vpop.eup %2093  ;;  %v906_v0 = vadd.f32 1.0, %v2092_v62 }
 0x2de   : > { %v905_v2 = vadd.f32 1.0, %v2094_v63 }
 0x2df   : > { %2099 = vrcp.f32 %v906_v0 }
 0x2e0   : > { %v2096_v3 = vpop.eup %2095  ;;  %2101 = vrcp.f32 %v905_v2 }
 0x2e1   : > { %v2098_v4 = vpop.eup %2097  ;;  %v908_v5 = vadd.f32 1.0, %v2096_v3 }
 0x2e2   : > { %v907_v7 = vadd.f32 1.0, %v2098_v4 }
 0x2e3   : > { %2103 = vrcp.f32 %v908_v5 }
 0x2e4   : > { %2105 = vrcp.f32 %v907_v7 }
 0x2e9   : > { %v2100_v9 = vpop.eup %2099 }
 0x2ea   : > { %v2102_v11 = vpop.eup %2101  ;;  %v918_v12 = vmul.f32 %v2100_v9, %v880_v43 }
 0x2eb   : > { %v917_v13 = vmul.f32 %v2102_v11, %v875_v47 }
 0x2ed   : > { %v2104_v15 = vpop.eup %2103  ;;  %v1991_v16 = vpack.c.bf16 %v918_v12, %v917_v13 }
 0x2ee   : > { %v2106_v17 = vpop.eup %2105  ;;  %v920_v18 = vmul.f32 %v2104_v15, %v890_v56 }
 0x2ef   : > { %v919_v19 = vmul.f32 %v2106_v17, %v885_v58  ;;  %1992 = vmatpush3.bf16.msra.mxu0 %v1991_v16 }
 0x2f0   : > { %1993 = vmatprep.subr.bf16.mxu0 %v2236_v38 }
 0x2f1   : > { %v1994_v20 = vpack.c.bf16 %v920_v18, %v919_v19  ;;  %v1215_v19 = vpop.permute.xlu1 %1214 }
 0x2f3   : > { %1995 = vmatpush3.bf16.msra.mxu0 %v1994_v20 }
 0x2f4   : > { %1996 = vmatprep.subr.bf16.mxu0 %v2236_v38 }
 0x2f5   : > { %v1225_v28 = vpop.permute.xlu1 %1224 }
 0x2f6   : > { %1925 = vmatmul.mubr.msk.f32.vlgmr.msra.gmra.mrb[6].mxu0 %vm703_vm2, %v2444_v23 }
 0x2f7   : > { %1943 = vmatprep.mubr.msk.f32.mxu0 %vm2237_vm1, %v2238_v39 }
 0x3c9   : > { %v987_v21 = vpop.f32.mrb[6].mxu0 }
 0x3ca   : > { %v991_v22 = vmul.f32 %v987_v21, %v2455_v29  ;;  %v1926_v24 = vpop.f32.mrb[7].mxu0 }
 0x3cc   : > { %v992_v25 = vadd.f32 %v991_v22, %v779_v36  ;;  %v1016_v36 = vpop.permute.xlu0 %1015  ;;  %v1232_v22 = vadd.f32 %v1215_v19, %v2430_v48 }
 0x3cd   : > { %v1021_v41 = vadd.f32 %v1016_v36, %v2434_v55 }
 0x3ce   : > { %v993_v26 = vadd.f32 %v992_v25, %v2459_v34 }
 0x3d0   : > { %1927 = vmatprep.subr.mxu1 %v993_v26  ;;  %v1220_v18 = vpop.permute.xlu0 %1219 }
 0x3d1   : > { %1928 = vmatpush3.msra.mxu1 %v993_v26  ;;  %v1233_v20 = vadd.f32 %v1220_v18, %v2428_v45 }
 0x3d2   : > { %1930 = vmatmul.mubr.msk.f32.vlgmr.msra.gmra.mrb[8].mxu1 %vm470_vm0, %v2379_v8 }
 0x3d3   : > { %1932 = vmatprep.mubr.msk.f32.mxu1 %vm470_vm0, %v2388_v10 }
 0x3d6   : > { %1933 = vmatmul.mubr.msk.f32.gmra.mrb[10].mxu1 %vm470_vm0, %v2403_v14 }
 0x3d7   : > { %1948 = vmatprep.mubr.msk.f32.mxu1 %vm470_vm0, %v2352_v1 }
 0x4a5   : > { %v1931_v31 = vpop.f32.mrb[8].mxu1 }
 0x4a6   : > { %v1094_v33 = vadd.f32 %v1931_v31, %v1019_v30  ;;  %v1088_v35 = vpop.f32.mrb[9].mxu1 }
 0x4a7   : > { %v1089_v37 = vadd.f32 %v1088_v35, %v1018_v32  ;;  %v1234_v35 = vadd.f32 %v1225_v28, %v2436_v59 }
 0x4a8   : > { %v1799_v6 = vmul.f32 -1.442695, %v1094_v33 }
 0x4a9   : > { %v1798_v42 = vmul.f32 -1.442695, %v1089_v37  ;;  %v1934_v43 = vpop.f32.mrb[10].mxu1 }
 0x4aa   : > { %2107 = vpow2.f32 %v1799_v6  ;;  %v1104_v46 = vadd.f32 %v1934_v43, %v1021_v41  ;;  %v1098_v47 = vpop.f32.mrb[11].mxu1 }
 0x4ab   : > { %2109 = vpow2.f32 %v1798_v42  ;;  %v1099_v49 = vadd.f32 %v1098_v47, %v1020_v44 }
 0x4ac   : > { %v1801_v50 = vmul.f32 -1.442695, %v1104_v46 }
 0x4ad   : > { %v1800_v51 = vmul.f32 -1.442695, %v1099_v49 }
 0x4ae   : > { %2111 = vpow2.f32 %v1801_v50 }
 0x4af   : > { %2113 = vpow2.f32 %v1800_v51 }
 0x4b4   : > { %v2108_v52 = vpop.eup %2107 }
 0x4b5   : > { %v2110_v53 = vpop.eup %2109  ;;  %v1120_v54 = vadd.f32 1.0, %v2108_v52 }
 0x4b6   : > { %v1119_v56 = vadd.f32 1.0, %v2110_v53 }
 0x4b7   : > { %2115 = vrcp.f32 %v1120_v54 }
 0x4b8   : > { %v2112_v57 = vpop.eup %2111  ;;  %2117 = vrcp.f32 %v1119_v56 }
 0x4b9   : > { %v2114_v58 = vpop.eup %2113  ;;  %v1122_v60 = vadd.f32 1.0, %v2112_v57 }
 0x4ba   : > { %v1121_v61 = vadd.f32 1.0, %v2114_v58 }
 0x4bb   : > { %2119 = vrcp.f32 %v1122_v60 }
 0x4bc   : > { %2121 = vrcp.f32 %v1121_v61 }
 0x4c1   : > { %v2116_v62 = vpop.eup %2115 }
 0x4c2   : > { %v2118_v63 = vpop.eup %2117  ;;  %v1132_v0 = vmul.f32 %v2116_v62, %v1094_v33 }
 0x4c3   : > { %v1131_v2 = vmul.f32 %v2118_v63, %v1089_v37 }
 0x4c5   : > { %v2120_v3 = vpop.eup %2119  ;;  %v1997_v4 = vpack.c.bf16 %v1132_v0, %v1131_v2 }
 0x4c6   : > { %v2122_v5 = vpop.eup %2121  ;;  %v1134_v7 = vmul.f32 %v2120_v3, %v1104_v46 }
 0x4c7   : > { %v1133_v9 = vmul.f32 %v2122_v5, %v1099_v49  ;;  %1998 = vmatpush3.bf16.msra.mxu0 %v1997_v4  ;;  %v1429_v5 = vpop.permute.xlu1 %1428 }
 0x4c8   : > { %1999 = vmatprep.subr.bf16.mxu0 %v2236_v38 }
 0x4c9   : > { %v2000_v11 = vpack.c.bf16 %v1134_v7, %v1133_v9 }
 0x4cb   : > { %2001 = vmatpush3.bf16.msra.mxu0 %v2000_v11  ;;  %v1446_v11 = vadd.f32 %v1429_v5, %v2430_v48 }
 0x4cc   : > { %2002 = vmatprep.subr.bf16.mxu0 %v2236_v38 }
 0x4ce   : > { %1944 = vmatmul.mubr.msk.f32.vlgmr.msra.gmra.mrb[8].mxu0 %vm703_vm2, %v2444_v23 }
 0x4cf   : > { %1962 = vmatprep.mubr.msk.f32.mxu0 %vm2237_vm1, %v2238_v39 }
 0x5a1   : > { %v1201_v12 = vpop.f32.mrb[8].mxu0 }
 0x5a2   : > { %v1205_v13 = vmul.f32 %v1201_v12, %v2455_v29  ;;  %v1945_v15 = vpop.f32.mrb[9].mxu0 }
 0x5a4   : > { %v1206_v16 = vadd.f32 %v1205_v13, %v993_v26  ;;  %v1230_v26 = vpop.permute.xlu0 %1229 }
 0x5a5   : > { %v1235_v31 = vadd.f32 %v1230_v26, %v2434_v55 }
 0x5a6   : > { %v1207_v17 = vadd.f32 %v1206_v16, %v2459_v34 }
 0x5a8   : > { %1946 = vmatprep.subr.mxu1 %v1207_v17 }
 0x5a9   : > { %1947 = vmatpush3.msra.mxu1 %v1207_v17 }
 0x5aa   : > { %1949 = vmatmul.mubr.msk.f32.vlgmr.msra.gmra.mrb[12].mxu1 %vm470_vm0, %v2379_v8 }
 0x5ab   : > { %1951 = vmatprep.mubr.msk.f32.mxu1 %vm470_vm0, %v2388_v10 }
 0x5ae   : > { %1952 = vmatmul.mubr.msk.f32.gmra.mrb[14].mxu1 %vm470_vm0, %v2403_v14 }
 0x5af   : > { %1967 = vmatprep.mubr.msk.f32.mxu1 %vm470_vm0, %v2352_v1 }
 0x67d   : > { %v1950_v21 = vpop.f32.mrb[12].mxu1 }
 0x67e   : > { %v1308_v24 = vadd.f32 %v1950_v21, %v1233_v20  ;;  %v1302_v25 = vpop.f32.mrb[13].mxu1 }
 0x67f   : > { %v1303_v27 = vadd.f32 %v1302_v25, %v1232_v22 }
 0x680   : > { %v1808_v30 = vmul.f32 -1.442695, %v1308_v24 }
 0x681   : > { %v1807_v32 = vmul.f32 -1.442695, %v1303_v27  ;;  %v1953_v33 = vpop.f32.mrb[14].mxu1 }
 0x682   : > { %2123 = vpow2.f32 %v1808_v30  ;;  %v1318_v1 = vadd.f32 %v1953_v33, %v1235_v31  ;;  %v1312_v36 = vpop.f32.mrb[15].mxu1 }
 0x683   : > { %2125 = vpow2.f32 %v1807_v32  ;;  %v1313_v37 = vadd.f32 %v1312_v36, %v1234_v35 }
 0x684   : > { %v1810_v40 = vmul.f32 -1.442695, %v1318_v1 }
 0x685   : > { %v1809_v6 = vmul.f32 -1.442695, %v1313_v37 }
 0x686   : > { %2127 = vpow2.f32 %v1810_v40 }
 0x687   : > { %2129 = vpow2.f32 %v1809_v6 }
 0x68c   : > { %v2124_v41 = vpop.eup %2123 }
 0x68d   : > { %v2126_v42 = vpop.eup %2125  ;;  %v1334_v43 = vadd.f32 1.0, %v2124_v41 }
 0x68e   : > { %v1333_v44 = vadd.f32 1.0, %v2126_v42 }
 0x68f   : > { %2131 = vrcp.f32 %v1334_v43 }
 0x690   : > { %v2128_v46 = vpop.eup %2127  ;;  %2133 = vrcp.f32 %v1333_v44 }
 0x691   : > { %v2130_v47 = vpop.eup %2129  ;;  %v1336_v49 = vadd.f32 1.0, %v2128_v46 }
 0x692   : > { %v1335_v50 = vadd.f32 1.0, %v2130_v47 }
 0x693   : > { %2135 = vrcp.f32 %v1336_v49 }
 0x694   : > { %2137 = vrcp.f32 %v1335_v50 }
 0x699   : > { %v2132_v51 = vpop.eup %2131 }
 0x69a   : > { %v2134_v52 = vpop.eup %2133  ;;  %v1346_v53 = vmul.f32 %v2132_v51, %v1308_v24 }
 0x69b   : > { %v1345_v54 = vmul.f32 %v2134_v52, %v1303_v27 }
 0x69d   : > { %v2136_v56 = vpop.eup %2135  ;;  %v2003_v57 = vpack.c.bf16 %v1346_v53, %v1345_v54 }
 0x69e   : > { %v2138_v58 = vpop.eup %2137  ;;  %v1348_v60 = vmul.f32 %v2136_v56, %v1318_v1 }
 0x69f   : > { %v1347_v61 = vmul.f32 %v2138_v58, %v1313_v37  ;;  %2004 = vmatpush3.bf16.msra.mxu0 %v2003_v57 }
 0x6a0   : > { %2005 = vmatprep.subr.bf16.mxu0 %v2236_v38 }
 0x6a1   : > { %v2006_v62 = vpack.c.bf16 %v1348_v60, %v1347_v61 }
 0x6a3   : > { %2007 = vmatpush3.bf16.msra.mxu0 %v2006_v62 }
 0x6a4   : > { %2008 = vmatprep.subr.bf16.mxu0 %v2236_v38 }
 0x6a6   : > { %1963 = vmatmul.mubr.msk.f32.vlgmr.msra.gmra.mrb[10].mxu0 %vm703_vm2, %v2444_v23 }
 0x6a7   : > { %1981 = vmatprep.mubr.msk.f32.mxu0 %vm2237_vm1, %v2238_v39  ;;  %v1434_v39 = vpop.permute.xlu0 %1433 }
 0x6a8   : > { %v1447_v7 = vadd.f32 %v1434_v39, %v2428_v45 }
 0x6ab   : > { %v1444_v15 = vpop.permute.xlu0 %1443 }
 0x779   : > { %v1415_v63 = vpop.f32.mrb[10].mxu0 }
 0x77a   : > { %v1419_v0 = vmul.f32 %v1415_v63, %v2455_v29  ;;  %v1964_v2 = vpop.f32.mrb[11].mxu0 }
 0x77c   : > { %v1420_v3 = vadd.f32 %v1419_v0, %v1207_v17  ;;  %v1439_v17 = vpop.permute.xlu1 %1438 }
 0x77d   : > { %v1448_v20 = vadd.f32 %v1439_v17, %v2436_v59 }
 0x77e   : > { %v2523_v4 = vadd.f32 %v1420_v3, %v2459_v34 }
 0x780   : > { %1965 = vmatprep.subr.mxu1 %v2523_v4 }
 0x781   : > { %1966 = vmatpush3.msra.mxu1 %v2523_v4 }
 0x782   : > { %1968 = vmatmul.mubr.msk.f32.vlgmr.msra.gmra.mrb[16].mxu1 %vm470_vm0, %v2379_v8  ;;  %v1449_v8 = vadd.f32 %v1444_v15, %v2434_v55 }
 0x783   : > { %1970 = vmatprep.mubr.msk.f32.mxu1 %vm470_vm0, %v2388_v10 }
 0x786   : > { %1971 = vmatmul.mubr.msk.f32.gmra.mrb[18].mxu1 %vm470_vm0, %v2403_v14 }
 0x855   : > { %v1969_v9 = vpop.f32.mrb[16].mxu1 }
 0x856   : > { %v1522_v12 = vadd.f32 %v1969_v9, %v1447_v7  ;;  %v1516_v13 = vpop.f32.mrb[17].mxu1 }
 0x857   : > { %v1517_v16 = vadd.f32 %v1516_v13, %v1446_v11 }
 0x858   : > { %v1817_v18 = vmul.f32 -1.442695, %v1522_v12 }
 0x859   : > { %v1816_v19 = vmul.f32 -1.442695, %v1517_v16  ;;  %v1972_v10 = vpop.f32.mrb[18].mxu1 }
 0x85a   : > { %2139 = vpow2.f32 %v1817_v18  ;;  %v1532_v14 = vadd.f32 %v1972_v10, %v1449_v8  ;;  %v1526_v21 = vpop.f32.mrb[19].mxu1 }
 0x85b   : > { %2141 = vpow2.f32 %v1816_v19  ;;  %v1527_v45 = vadd.f32 %v1526_v21, %v1448_v20 }
 0x85c   : > { %v1819_v22 = vmul.f32 -1.442695, %v1532_v14 }
 0x85d   : > { %v1818_v24 = vmul.f32 -1.442695, %v1527_v45 }
 0x85e   : > { %2143 = vpow2.f32 %v1819_v22 }
 0x85f   : > { %2145 = vpow2.f32 %v1818_v24 }
 0x864   : > { %v2140_v48 = vpop.eup %2139 }
 0x865   : > { %v2142_v25 = vpop.eup %2141  ;;  %v1548_v26 = vadd.f32 1.0, %v2140_v48 }
 0x866   : > { %v1547_v27 = vadd.f32 1.0, %v2142_v25 }
 0x867   : > { %2147 = vrcp.f32 %v1548_v26 }
 0x868   : > { %v2144_v28 = vpop.eup %2143  ;;  %2149 = vrcp.f32 %v1547_v27 }
 0x869   : > { %v2146_v55 = vpop.eup %2145  ;;  %v1550_v30 = vadd.f32 1.0, %v2144_v28 }
 0x86a   : > { %v1549_v31 = vadd.f32 1.0, %v2146_v55 }
 0x86b   : > { %2151 = vrcp.f32 %v1550_v30 }
 0x86c   : > { %2153 = vrcp.f32 %v1549_v31 }
 0x871   : > { %v2148_v59 = vpop.eup %2147 }
 0x872   : > { %v2150_v32 = vpop.eup %2149  ;;  %v1560_v33 = vmul.f32 %v2148_v59, %v1522_v12 }
 0x873   : > { %v1559_v35 = vmul.f32 %v2150_v32, %v1517_v16 }
 0x875   : > { %v2152_v1 = vpop.eup %2151  ;;  %v2009_v36 = vpack.c.bf16 %v1560_v33, %v1559_v35 }
 0x876   : > { %v2154_v37 = vpop.eup %2153  ;;  %v1562_v40 = vmul.f32 %v2152_v1, %v1532_v14 }
 0x877   : > { %v1561_v6 = vmul.f32 %v2154_v37, %v1527_v45  ;;  %2010 = vmatpush3.bf16.msra.mxu0 %v2009_v36 }
 0x878   : > { %2011 = vmatprep.subr.bf16.mxu0 %v2236_v38 }
 0x879   : > { %v2012_v41 = vpack.c.bf16 %v1562_v40, %v1561_v6 }
 0x87b   : > { %2013 = vmatpush3.bf16.msra.mxu0 %v2012_v41 }
 0x87e   : > { %1982 = vmatmul.mubr.msk.f32.vlgmr.msra.gmra.mrb[12].mxu0 %vm703_vm2, %v2444_v23 }
 0x951   : > { %v1629_v42 = vpop.f32.mrb[12].mxu0 }
 0x952   : > { %v1633_v43 = vmul.f32 %v1629_v42, %v2455_v29  ;;  %v1983_v44 = vpop.f32.mrb[13].mxu0 }
 0x954   : > { %v1634_v46 = vadd.f32 %v1633_v43, %v2523_v4 }
 0x956   : > { %v1635_v47 = vadd.f32 %v1634_v46, %v2459_v34 }
 0x958   : > { %1636 = vst [vmem:[%s400_s17] sm:$0xff] %v1635_v47 }
 0x959   : > { %2168 = shalt.err (!%p2165_p5)
}
 0x95a   : > { %s2169_s25 = scalar_lea.hbm %s2548_s20, 128  ;;  %s2173_s29 = scalar_lea.hbm %s2604_s9, 256 }
 0x95b   : > { %p2170_p6 = scmp.ne.s32.totalorder %s2548_s20, %s2169_s25  ;;  %p2174_p10 = scmp.lt.u32.totalorder %s2548_s20, %s2604_s9 }
 0x95c   : > { %p2175_p11 = scmp.lt.u32.totalorder %s2173_s29, %s2169_s25  ;;  %p2177_p13 = scmp.lt.u32.totalorder %s2169_s25, %s2548_s20 }
 0x95d   : > { %p2171_p7 = pnand %p2170_p6, %p2330_p4 }
 0x95e   : > { %p2176_p12 = por %p2175_p11, %p2174_p10 }
 0x95f   : > { %p2172_p9 = pneg %p2171_p7 }
 0x960   : > { %p2178_p0 = por %p2177_p13, %p2176_p12 }
 0x962   : > { %p2179_p1 = pnand %p2178_p0, %p2172_p9 }
 0x964   : > { %2182 = shalt.err (!%p2179_p1)
}
 0x965   : > { %2014 = dma.vmem_to_hbm [thread:$0]  (%p2330_p4), %s2550_s28, 128, %s2548_s20, %s1638_s13  }
 0x966 PF: > { %p2020_p2 = scmp.ge.s32.totalorder %s2233_s14, 2  ;;  %s1664_s16 = sand.u32 1, %s2213_s30  }
 0x967   : > { %s1665_s18 = scalar_lea.sflag [#allocation3], %s1664_s16 }
 0x968   : > { %p2017_p3 = pnand %p2020_p2, %p2337_p8 }
 0x96a   : > { %2208 = dma.done.wait (!%p2017_p3), %s1665_s18, 128  }
 0x96b   : > { %2210 = vsyncadd (!%p2017_p3), %s1665_s18, 4294967168  ;;  %s22_s14 = sadd.s32 1, %s2233_s14   ;;  %s2612_s19 = sld [smem:[#allocation7_spill]] }
 0x96c   : > { %p19_p5 = scmp.ge.s32.totalorder %s22_s14, 4   ;;  %s2613_s12 = sld [smem:[#allocation5_spill]] }
 0x96d   : > { %s2614_s13 = sld [smem:[#allocation6_spill]]  ;;  %s2615_s30 = smov %s2217_s10 }
 0x96e   : > { %s2616_s10 = smov %s2221_s11  ;;  %21 = sbr.rel (!%p19_p5) target bundleno = 4 (0x4), region = 100 }
 0x971   : > { %s2617_s11 = smov %s2612_s19 }
 0x975   :  { %1670 = vsyncpa [#allocation3], 1 }
 0x976   :  { %1672 = vsyncpa [#allocation3 + $0x1], 1 }

</bundles_post_ra>
